<compile_context>
chip_gen: v6e
topology: v6e:2x2x1
jax: 0.10.0
libtpu: 0.0.40
codegen_flags: <defaults>
</compile_context>

<pallas_src>
import jax
import jax.numpy as jnp
from jax.experimental import pallas as pl
from jax.experimental.pallas import tpu as pltpu


def _round_up(x, m):
    return ((x + m - 1) // m) * m


def _cdiv(a, b):
    return -(-a // b)


# --------------------------------- kernels ---------------------------------

def _linear_kernel_fused(x_ref, w_ref, b_ref, o_ref):
    # Whole contraction in one shot: (TB, K) @ (K, TN) + (1, TN) -> (TB, TN).
    o_ref[...] = (
        jnp.dot(x_ref[...], w_ref[...], preferred_element_type=jnp.float32)
        + b_ref[...]
    ).astype(o_ref.dtype)


def _linear_kernel_streamk(x_ref, w_ref, b_ref, o_ref, acc_ref):
    # Streamed contraction: innermost grid axis walks K with an f32 VMEM accumulator.
    k = pl.program_id(2)

    @pl.when(k == 0)
    def _():
        acc_ref[...] = jnp.zeros_like(acc_ref)

    acc_ref[...] += jnp.dot(x_ref[...], w_ref[...],
                            preferred_element_type=jnp.float32)

    @pl.when(k == pl.num_programs(2) - 1)
    def _():
        o_ref[...] = (acc_ref[...] + b_ref[...]).astype(o_ref.dtype)


# --------------------------------- wrapper ----------------------------------

class PallasClassifier:
    """Pallas equivalent of PyTorch nn.Linear(dim, n_way): y = x @ weight.T + bias.

    weight: (n_way, dim)  bias: (n_way,). Parameter padding/transpose happens once
    here (setup time); the per-call forward only pads/casts the activations.
    """

    _SLAB_BUDGET = 16 << 20    # double-buffered weight slab per tile (v7x-safe)
    _VMEM_SOFT_CAP = 40 << 20  # total working-set target (fits v7x's 64 MiB)

    def __init__(self, weight, bias, *, compute_dtype=None,
                 tile_n_max=1024, tile_k_max=2048, tile_b_max=512):
        n_way, dim = weight.shape
        assert bias.shape == (n_way,)
        self.n_way, self.dim = n_way, dim
        self.compute_dtype = jnp.dtype(
            weight.dtype if compute_dtype is None else compute_dtype)
        cbytes = self.compute_dtype.itemsize
        self.tile_b_max = tile_b_max
        # Sublane-packing multiple of the compute dtype: f32->8, bf16->16, 8-bit->32.
        self.align_b = max(8, 32 // cbytes)

        # ---- tile_n: balanced, lane-aligned, minimal padding ----
        n_tiles_n = _cdiv(n_way, tile_n_max)
        tile_n = _round_up(_cdiv(n_way, n_tiles_n), 128)
        N_p = tile_n * n_tiles_n

        # ---- tile_k: collapse the whole contraction into one tile when it fits ----
        K_full = _round_up(dim, 128)
        if K_full <= tile_k_max and K_full * tile_n * cbytes * 2 <= self._SLAB_BUDGET:
            tile_k, n_tiles_k = K_full, 1
        else:
            tk_cap = max(128, (self._SLAB_BUDGET // (tile_n * cbytes * 2)) // 128 * 128)
            tk_cap = min(tk_cap, max(128, tile_k_max))
            n_tiles_k = _cdiv(dim, tk_cap)
            tile_k = _round_up(_cdiv(dim, n_tiles_k), 128)
        K_p = tile_k * n_tiles_k

        self.tile_n, self.n_tiles_n, self.N_p = tile_n, n_tiles_n, N_p
        self.tile_k, self.n_tiles_k, self.K_p = tile_k, n_tiles_k, K_p

        # ---- pad + transpose parameters ONCE (outside the per-call forward) ----
        w_t = weight.astype(self.compute_dtype).T                    # (dim, n_way)
        self.w_p = jnp.zeros((K_p, N_p), self.compute_dtype).at[:dim, :n_way].set(w_t)
        self.b_p = jnp.zeros((1, N_p), jnp.float32).at[0, :n_way].set(
            bias.astype(jnp.float32))

    def __call__(self, x):
        B, dim = x.shape
        assert dim == self.dim
        out_dtype = x.dtype
        cdt = self.compute_dtype
        align_b = self.align_b

        # ---- batch tiling: fat tiles (weight reuse), balanced padding ----
        n_tiles_b = _cdiv(B, self.tile_b_max)
        # v7x megacore: make sure >=1 'parallel' axis has >=2 blocks when possible.
        if n_tiles_b == 1 and self.n_tiles_n == 1 and B >= 2 * align_b:
            n_tiles_b = 2
        tile_b = _round_up(_cdiv(B, n_tiles_b), align_b)

        def vmem_estimate(tb):
            x_bytes = tb * self.tile_k * cdt.itemsize * 2
            w_bytes = self.tile_k * self.tile_n * cdt.itemsize * 2
            b_bytes = 8 * self.tile_n * 4 * 2
            o_bytes = tb * self.tile_n * jnp.dtype(out_dtype).itemsize * 2
            acc_bytes = tb * self.tile_n * 4 if self.n_tiles_k > 1 else 0
            return x_bytes + w_bytes + b_bytes + o_bytes + acc_bytes

        while vmem_estimate(tile_b) > self._VMEM_SOFT_CAP and tile_b > align_b:
            n_tiles_b *= 2
            tile_b = _round_up(_cdiv(B, n_tiles_b), align_b)
        B_p = tile_b * n_tiles_b

        # ---- pad/cast activations only (weight/bias were prepared once) ----
        if x.shape == (B_p, self.K_p) and x.dtype == cdt:
            x_p = x
        else:
            x_p = jnp.zeros((B_p, self.K_p), cdt).at[:B, :dim].set(x.astype(cdt))

        vmem_limit = int(min(max(int(vmem_estimate(tile_b) * 1.5) + (2 << 20),
                                 16 << 20), 48 << 20))

        cost = pl.CostEstimate(
            flops=2 * B_p * self.K_p * self.N_p,
            transcendentals=0,
            bytes_accessed=int(x_p.size * cdt.itemsize
                               + self.w_p.size * cdt.itemsize
                               + self.b_p.size * 4
                               + B_p * self.N_p * jnp.dtype(out_dtype).itemsize),
        )

        if self.n_tiles_k == 1:
            # Fused contraction: no accumulator scratch, no K axis. Grid order is
            # (N-tiles outer, B-tiles inner) so the weight block index is constant
            # across inner steps -> it is DMA'd once and stays VMEM-resident.
            out_p = pl.pallas_call(
                _linear_kernel_fused,
                out_shape=jax.ShapeDtypeStruct((B_p, self.N_p), out_dtype),
                grid_spec=pltpu.PrefetchScalarGridSpec(
                    num_scalar_prefetch=0,
                    grid=(self.n_tiles_n, n_tiles_b),
                    in_specs=[
                        pl.BlockSpec((tile_b, self.tile_k), lambda j, i: (i, 0)),
                        pl.BlockSpec((self.tile_k, self.tile_n), lambda j, i: (0, j)),
                        pl.BlockSpec((1, self.tile_n), lambda j, i: (0, j)),
                    ],
                    out_specs=pl.BlockSpec((tile_b, self.tile_n), lambda j, i: (i, j)),
                ),
                compiler_params=pltpu.CompilerParams(
                    dimension_semantics=("parallel", "parallel"),
                    vmem_limit_bytes=vmem_limit,
                ),
                cost_estimate=cost,
            )(x_p, self.w_p, self.b_p)
        else:
            # Fallback stream-K path for very large `dim`.
            out_p = pl.pallas_call(
                _linear_kernel_streamk,
                out_shape=jax.ShapeDtypeStruct((B_p, self.N_p), out_dtype),
                grid_spec=pltpu.PrefetchScalarGridSpec(
                    num_scalar_prefetch=0,
                    grid=(self.n_tiles_n, n_tiles_b, self.n_tiles_k),
                    in_specs=[
                        pl.BlockSpec((tile_b, self.tile_k), lambda j, i, k: (i, k)),
                        pl.BlockSpec((self.tile_k, self.tile_n), lambda j, i, k: (k, j)),
                        pl.BlockSpec((1, self.tile_n), lambda j, i, k: (0, j)),
                    ],
                    out_specs=pl.BlockSpec((tile_b, self.tile_n),
                                           lambda j, i, k: (i, j)),
                    scratch_shapes=[pltpu.VMEM((tile_b, self.tile_n), jnp.float32)],
                ),
                compiler_params=pltpu.CompilerParams(
                    dimension_semantics=("parallel", "parallel", "arbitrary"),
                    vmem_limit_bytes=vmem_limit,
                ),
                cost_estimate=cost,
            )(x_p, self.w_p, self.b_p)

        # Slice padding back off (padded columns are exactly zero, padded rows dropped).
        return out_p[:B, :self.n_way]


if __name__ == "__main__":
    # ---- Small shapes consistent with the module (exact f32 nn.Linear semantics). ----
    B, dim, n_way = 8, 32, 5
    kx, kw, kb = jax.random.split(jax.random.PRNGKey(0), 3)
    bound = 1.0 / (dim ** 0.5)
    x = jax.random.normal(kx, (B, dim), dtype=jnp.float32)
    weight = jax.random.uniform(kw, (n_way, dim), jnp.float32, -bound, bound)
    bias = jax.random.uniform(kb, (n_way,), jnp.float32, -bound, bound)

    clf = PallasClassifier(weight, bias)              # f32 compute (exact semantics)
    out = jax.block_until_ready(clf(x))
    ref = jnp.dot(x, weight.T, precision=jax.lax.Precision.HIGHEST) + bias
    assert out.shape == (B, n_way)
    assert jnp.allclose(out, ref, atol=1e-4, rtol=1e-4), "small f32 case mismatch"

    # ---- Larger, non-aligned shapes: balanced tiling, fused-K path, bf16 fast path. ----
    B2, dim2, n2 = 300, 600, 600
    kx2, kw2, kb2 = jax.random.split(jax.random.PRNGKey(1), 3)
    bound2 = 1.0 / (dim2 ** 0.5)
    x2 = jax.random.normal(kx2, (B2, dim2), dtype=jnp.float32)
    w2 = jax.random.uniform(kw2, (n2, dim2), jnp.float32, -bound2, bound2)
    b2 = jax.random.uniform(kb2, (n2,), jnp.float32, -bound2, bound2)

    clf2 = PallasClassifier(w2, b2, compute_dtype=jnp.bfloat16)   # opt-in fast path
    out2 = jax.block_until_ready(clf2(x2))
    ref2 = jnp.dot(x2.astype(jnp.bfloat16), w2.T.astype(jnp.bfloat16),
                   preferred_element_type=jnp.float32) + b2
    assert out2.shape == (B2, n2)
    assert jnp.allclose(out2, ref2, atol=2e-2, rtol=2e-2), "bf16 case mismatch"

    # ---- Force the stream-K fallback path (accumulator kernel) and re-check. ----
    clf3 = PallasClassifier(w2, b2, compute_dtype=jnp.bfloat16, tile_k_max=256)
    out3 = jax.block_until_ready(clf3(x2))
    assert jnp.allclose(out3, ref2, atol=2e-2, rtol=2e-2), "stream-K case mismatch"

    print("KERNEL_OK")
</pallas_src>

<mosaic_0001>
module attributes {stable_mosaic.version = 11 : i64} {
  func.func @_linear_kernel_fused(%arg0: i32, %arg1: i32, %arg2: memref<8x128xf32, #tpu.memory_space<vmem>>, %arg3: memref<128x128xf32, #tpu.memory_space<vmem>>, %arg4: memref<1x128xf32, #tpu.memory_space<vmem>>, %arg5: memref<8x128xf32, #tpu.memory_space<vmem>>) attributes {dimension_semantics = [#tpu.dimension_semantics<parallel>, #tpu.dimension_semantics<parallel>], iteration_bounds = array<i64: 1, 1>, scalar_prefetch = 0 : i64, scratch_operands = 0 : i64, tpu.core_type = #tpu.core_type<tc>, window_params = [{transform_indices = @transform_0, window_bounds = array<i64: 8, 128>}, {transform_indices = @transform_1, window_bounds = array<i64: 128, 128>}, {transform_indices = @transform_2, window_bounds = array<i64: 1, 128>}, {transform_indices = @transform_3, window_bounds = array<i64: 8, 128>}]} {
    %c0 = arith.constant 0 : index
    %c0_0 = arith.constant 0 : index
    %0 = vector.load %arg2[%c0, %c0_0] : memref<8x128xf32, #tpu.memory_space<vmem>>, vector<8x128xf32>
    %c0_1 = arith.constant 0 : index
    %c0_2 = arith.constant 0 : index
    %1 = vector.load %arg3[%c0_1, %c0_2] : memref<128x128xf32, #tpu.memory_space<vmem>>, vector<128x128xf32>
    %cst = arith.constant dense<0.000000e+00> : vector<8x128xf32>
    %2 = tpu.matmul %0, %1, %cst {dimension_numbers = #tpu.dot_dimension_numbers<[1], [0], [0], [1], [0, 0, 1, 1], [], []>} : vector<8x128xf32>, vector<128x128xf32>, vector<8x128xf32> -> vector<8x128xf32>
    %c0_3 = arith.constant 0 : index
    %c0_4 = arith.constant 0 : index
    %3 = vector.load %arg4[%c0_3, %c0_4] : memref<1x128xf32, #tpu.memory_space<vmem>>, vector<1x128xf32>
    %4 = vector.broadcast %3 : vector<1x128xf32> to vector<8x128xf32>
    %5 = arith.addf %2, %4 : vector<8x128xf32>
    %c0_5 = arith.constant 0 : index
    %c0_6 = arith.constant 0 : index
    %6 = vector.load %arg5[%c0_5, %c0_6] : memref<8x128xf32, #tpu.memory_space<vmem>>, vector<8x128xf32>
    tpu.vector_store %arg5[%c0_5, %c0_6], %5 {strides = array<i32>} : memref<8x128xf32, #tpu.memory_space<vmem>>, vector<8x128xf32>,
    return
  }
  func.func @transform_0(%arg0: i32, %arg1: i32) -> (i32, i32) {
    %c0_i32 = arith.constant 0 : i32
    %c0_i32_0 = arith.constant 0 : i32
    return %arg1, %c0_i32 : i32, i32
  }
  func.func @transform_1(%arg0: i32, %arg1: i32) -> (i32, i32) {
    %c0_i32 = arith.constant 0 : i32
    %c0_i32_0 = arith.constant 0 : i32
    return %c0_i32, %arg0 : i32, i32
  }
  func.func @transform_2(%arg0: i32, %arg1: i32) -> (i32, i32) {
    %c0_i32 = arith.constant 0 : i32
    %c0_i32_0 = arith.constant 0 : i32
    return %c0_i32, %arg0 : i32, i32
  }
  func.func @transform_3(%arg0: i32, %arg1: i32) -> (i32, i32) {
    %c0_i32 = arith.constant 0 : i32
    return %arg1, %arg0 : i32, i32
  }
}

</mosaic_0001>

<bundles_post_ra>
// kernel: tpu_custom_call.1
= control target key start
LH: loop header
LB: loop body
LE: loop exit
PB: predicated region body
PF: predicated region fallthrough
CT: control target
= control target key end

     0   :  { %8 = vsyncpa [#allocation3], 0  ;;  %s317_s0 = inlined_call_operand.hbm [shape: f32[8,128], index: 0, kind: input, shape index: {}]   ;;  %s318_s1 = inlined_call_operand.hbm [shape: f32[128,128], index: 1, kind: input, shape index: {}]   ;;  %s319_s2 = inlined_call_operand.vmem [shape: f32[1,128], index: 2, kind: input, shape index: {}]   ;;  %s320_s3 = inlined_call_operand.hbm [shape: f32[8,128], index: 3, kind: output, shape index: {}]  }
   0x1   :  { %9 = vsyncpa [#allocation6], 0 }
   0x2   :  { %10 = vsyncpa [#allocation4], 0  ;;  %s278_s12 = smov [#allocation2]   ;;  %s279_s14 = smov [#allocation5]  }
   0x3   :  { %s17_s13 = sshll.u32 %s278_s12, 4  ;;  %s26_s15 = sshll.u32 %s279_s14, 4  ;;  %s18_s13 = int_to_ptr.vmem [resolvable:$true] %s17_s13  ;;  %s27_s15 = int_to_ptr.vmem [resolvable:$true] %s26_s15 }
   0x4   :  { %s220_s16 = scalar_lea.vmem %s18_s13, 128  ;;  %p225_p1 = scmp.lt.s32.totalorder %s18_s13, %s18_s13 }
   0x5   :  { %p221_p0 = scmp.ne.s32.totalorder %s18_s13, %s220_s16  ;;  %p226_p2 = scmp.lt.s32.totalorder %s220_s16, %s220_s16 }
   0x7   :  { %p227_p3 = por %p226_p2, %p225_p1 }
   0x9   :  { %p228_p4 = pnand %p227_p3, %p221_p0 }
   0xb   :  { %231 = shalt.err (!%p228_p4)
}
   0xc   :  { %20 = dma.hbm_to_vmem [thread:$0]  %s317_s0, 128, %s18_s13, [#allocation3]  }
   0xd   :  { %s240_s19 = scalar_lea.vmem %s27_s15, 2048  ;;  %p245_p6 = scmp.lt.s32.totalorder %s27_s15, %s27_s15 }
   0xe   :  { %p241_p5 = scmp.ne.s32.totalorder %s27_s15, %s240_s19  ;;  %p246_p7 = scmp.lt.s32.totalorder %s240_s19, %s240_s19 }
  0x10   :  { %p247_p8 = por %p246_p7, %p245_p6 }
  0x12   :  { %p248_p9 = pnand %p247_p8, %p241_p5 }
  0x14   :  { %251 = shalt.err (!%p248_p9)
}
  0x15   :  { %s280_s20 = smov 128   ;;  %s281_s21 = smov 8  }
  0x16   :  { %32 = dma.hbm_to_vmem [thread:$0]  %s318_s1, 2048, %s27_s15, [#allocation6], %s280_s20, %s280_s20, %s281_s21  }
  0x17   :  { %272 = dma.done.wait [#allocation3], 128  }
  0x18   :  { %273 = vsyncadd [#allocation3], 4294967168 }
  0x19   :  { %274 = dma.done.wait [#allocation6], 2048  }
  0x1a   :  { %275 = vsyncadd [#allocation6], 4294965248  ;;  %v282_v0 = vmov 0.0   ;;  %vm283_vm0 = vmmov 0   ;;  %v57_v1 = vld [vmem:[#allocation5 + $0x78] sm:$0xff]  ;;  %v56_v2 = vld [vmem:[#allocation5 + $0x70] sm:$0xff] }
  0x1b   :  { %170 = vmatprep.subr.mxu0 %v282_v0  ;;  %202 = vmatprep.mubr.msk.f32.mxu0 %vm283_vm0, %v282_v0  ;;  %v55_v3 = vld [vmem:[#allocation5 + $0x68] sm:$0xff]  ;;  %v54_v4 = vld [vmem:[#allocation5 + $0x60] sm:$0xff]  ;;  %v53_v5 = vld [vmem:[#allocation5 + $0x58] sm:$0xff]  ;;  %s284_s24 = smov [#allocation7]  }
  0x1c   :  { %171 = vmatpush3.msra.mxu0 %v57_v1  ;;  %v52_v6 = vld [vmem:[#allocation5 + $0x50] sm:$0xff]  ;;  %v51_v7 = vld [vmem:[#allocation5 + $0x48] sm:$0xff]  ;;  %v50_v8 = vld [vmem:[#allocation5 + $0x40] sm:$0xff]  ;;  %s142_s25 = sshll.u32 %s284_s24, 4  ;;  %s143_s25 = int_to_ptr.vmem [resolvable:$true] %s142_s25 }
  0x1d   :  { %172 = vmatprep.subr.mxu0 %v282_v0  ;;  %v49_v9 = vld [vmem:[#allocation5 + $0x38] sm:$0xff]  ;;  %v48_v10 = vld [vmem:[#allocation5 + $0x30] sm:$0xff]  ;;  %v47_v11 = vld [vmem:[#allocation5 + $0x28] sm:$0xff]  ;;  %s252_s26 = scalar_lea.vmem %s143_s25, 128  ;;  %p257_p11 = scmp.lt.s32.totalorder %s143_s25, %s143_s25 }
  0x1e   :  { %173 = vmatpush3.msra.mxu0 %v56_v2  ;;  %v46_v12 = vld [vmem:[#allocation5 + $0x20] sm:$0xff]  ;;  %v45_v13 = vld [vmem:[#allocation5 + $0x18] sm:$0xff]  ;;  %v44_v14 = vld [vmem:[#allocation5 + $0x10] sm:$0xff]  ;;  %p253_p10 = scmp.ne.s32.totalorder %s143_s25, %s252_s26  ;;  %p258_p12 = scmp.lt.s32.totalorder %s252_s26, %s252_s26 }
  0x1f   :  { %174 = vmatprep.subr.mxu0 %v282_v0  ;;  %v43_v15 = vld [vmem:[#allocation5 + $0x8] sm:$0xff]  ;;  %v42_v16 = vld [vmem:[#allocation5] sm:$0xff]  ;;  %v41_v17 = vld [vmem:[#allocation2] sm:$0xff] }
  0x20   :  { %175 = vmatpush3.msra.mxu0 %v55_v3  ;;  %v152_v18 = vld [vmem:[%s319_s2] ss:$0 sm:$0xff]  ;;  %p259_p13 = por %p258_p12, %p257_p11 }
  0x21   :  { %176 = vmatprep.subr.mxu0 %v282_v0 }
  0x22   :  { %177 = vmatpush3.msra.mxu0 %v54_v4  ;;  %p260_p0 = pnand %p259_p13, %p253_p10 }
  0x23   :  { %178 = vmatprep.subr.mxu0 %v282_v0 }
  0x24   :  { %179 = vmatpush3.msra.mxu0 %v53_v5 }
  0x25   :  { %180 = vmatprep.subr.mxu0 %v282_v0 }
  0x26   :  { %181 = vmatpush3.msra.mxu0 %v52_v6 }
  0x27   :  { %182 = vmatprep.subr.mxu0 %v282_v0 }
  0x28   :  { %183 = vmatpush3.msra.mxu0 %v51_v7 }
  0x29   :  { %184 = vmatprep.subr.mxu0 %v282_v0 }
  0x2a   :  { %185 = vmatpush3.msra.mxu0 %v50_v8 }
  0x2b   :  { %186 = vmatprep.subr.mxu0 %v282_v0 }
  0x2c   :  { %187 = vmatpush3.msra.mxu0 %v49_v9 }
  0x2d   :  { %188 = vmatprep.subr.mxu0 %v282_v0 }
  0x2e   :  { %189 = vmatpush3.msra.mxu0 %v48_v10 }
  0x2f   :  { %190 = vmatprep.subr.mxu0 %v282_v0 }
  0x30   :  { %191 = vmatpush3.msra.mxu0 %v47_v11 }
  0x31   :  { %192 = vmatprep.subr.mxu0 %v282_v0 }
  0x32   :  { %193 = vmatpush3.msra.mxu0 %v46_v12 }
  0x33   :  { %194 = vmatprep.subr.mxu0 %v282_v0 }
  0x34   :  { %195 = vmatpush3.msra.mxu0 %v45_v13 }
  0x35   :  { %196 = vmatprep.subr.mxu0 %v282_v0 }
  0x36   :  { %197 = vmatpush3.msra.mxu0 %v44_v14 }
  0x37   :  { %198 = vmatprep.subr.mxu0 %v282_v0 }
  0x38   :  { %199 = vmatpush3.msra.mxu0 %v43_v15 }
  0x39   :  { %200 = vmatprep.subr.mxu0 %v282_v0 }
  0x3a   :  { %201 = vmatpush3.msra.mxu0 %v42_v16 }
  0x3b   :  { %203 = vmatmul.mubr.f32.vlgmr.msra.gmra.mxu0 %v41_v17 }
  0xfb   :  { %v131_v19 = vpop.f32.mrf.mxu0 }
  0xfc   :  { %v132_v20 = vadd.f32 %v152_v18, %v131_v19 }
  0xfd   :  { %v204_v21 = vpop.f32.mrf.mxu0 }
  0xfe   :  { %135 = vst [vmem:[#allocation7] sm:$0xff] %v132_v20 }
  0xff   :  { %263 = shalt.err (!%p260_p0)
}
 0x100   :  { %145 = dma.vmem_to_hbm [thread:$0]  %s143_s25, 128, %s320_s3, [#allocation4]  }
 0x101   :  { %276 = dma.done.wait [#allocation4], 128  }
 0x102   :  { %277 = vsyncadd [#allocation4], 4294967168 }
 0x103   :  { %149 = vsyncpa [#allocation3], 1 }
 0x104   :  { %150 = vsyncpa [#allocation6], 1 }
 0x105   :  { %151 = vsyncpa [#allocation4], 1 }

</bundles_post_ra>
